<compile_context>
chip_gen: v7x
topology: tpu7x:2x2x1
jax: 0.10.0
libtpu: 0.0.40
codegen_flags: <defaults>
</compile_context>

<pallas_src>
import math

import jax
import jax.numpy as jnp
from jax.experimental import pallas as pl
from jax.experimental.pallas import tpu as pltpu


def _round_up(n, m):
    return ((n + m - 1) // m) * m


def _make_kernel(n_in_layers, n_out_layers, norm, mess_dropout):
    def kernel(*args):
        it = iter(args)
        ts_ref = next(it)                       # [TB, 1]
        freqs_ref = next(it)                    # [1, half]
        x_ref = next(it)                        # [TB, Dx]
        scale_ref = next(it) if mess_dropout else None
        w_emb_cos = next(it)[...]               # [half, E]
        w_emb_sin = next(it)[...]               # [half, E]
        b_emb = next(it)[...]                   # [1, E]
        w0_x = next(it)[...]                    # [Dx, d1]
        w0_e = next(it)[...]                    # [E,  d1]
        b0 = next(it)[...]                      # [1,  d1]
        in_rest = [(next(it)[...], next(it)[...]) for _ in range(n_in_layers - 1)]
        out_ws = [(next(it)[...], next(it)[...]) for _ in range(n_out_layers)]
        out_ref = next(it)

        # --- sinusoidal time embedding, concat-free (split emb weight) ---
        temp = ts_ref[...] * freqs_ref[...]                              # [TB, half]
        emb = (jnp.dot(jnp.cos(temp), w_emb_cos,
                       preferred_element_type=jnp.float32)
               + jnp.dot(jnp.sin(temp), w_emb_sin,
                         preferred_element_type=jnp.float32)
               + b_emb)                                                  # [TB, E]

        x = x_ref[...]
        if norm:
            # F.normalize: x / max(||x||, 1e-12)  ==  x * rsqrt(max(||x||^2, 1e-24))
            sq = jnp.sum(x * x, axis=-1, keepdims=True)
            x = x * jax.lax.rsqrt(jnp.maximum(sq, jnp.float32(1e-24)))
        if mess_dropout:
            # scale_ref holds {0, 1/(1-p)} per element (nn.Dropout semantics).
            x = x * scale_ref[...]

        # --- first in_layer on cat([x, emb], -1) via pre-split weight ---
        h = jnp.tanh(jnp.dot(x, w0_x, preferred_element_type=jnp.float32)
                     + jnp.dot(emb, w0_e, preferred_element_type=jnp.float32)
                     + b0)
        for w, b in in_rest:
            h = jnp.tanh(jnp.dot(h, w, preferred_element_type=jnp.float32) + b)
        for i, (w, b) in enumerate(out_ws):
            h = jnp.dot(h, w, preferred_element_type=jnp.float32) + b
            if i != n_out_layers - 1:
                h = jnp.tanh(h)
        out_ref[...] = h.astype(out_ref.dtype)

    return kernel


def init_params(key, in_dims, out_dims, emb_size):
    """Re-implementation of Denoise.init_weights (shapes / init law)."""
    in_dims_temp = [in_dims[0] + emb_size] + list(in_dims[1:])
    out_dims_temp = list(out_dims)

    def make_layers(dims, key):
        layers = []
        for d_in, d_out in zip(dims[:-1], dims[1:]):
            key, kw, kb = jax.random.split(key, 3)
            std = math.sqrt(2.0 / (d_in + d_out))
            layers.append((std * jax.random.normal(kw, (d_in, d_out), jnp.float32),
                           0.001 * jax.random.normal(kb, (1, d_out), jnp.float32)))
        return layers, key

    key, kw, kb = jax.random.split(key, 3)
    std = math.sqrt(2.0 / (emb_size + emb_size))
    params = {
        "emb": (std * jax.random.normal(kw, (emb_size, emb_size), jnp.float32),
                0.001 * jax.random.normal(kb, (1, emb_size), jnp.float32)),
    }
    params["in_layers"], key = make_layers(in_dims_temp, key)
    params["out_layers"], key = make_layers(out_dims_temp, key)
    return params


def denoise_forward(params, x, timesteps, *, norm=False, p_drop=0.5,
                    mess_dropout=True, dropout_key=None, block_rows=512):
    """Pallas forward for Denoise.  Weights stored pre-transposed [d_in, d_out]."""
    B, d_x = x.shape
    w_emb, b_emb = params["emb"]
    emb_size = w_emb.shape[0]
    half = emb_size // 2
    n_in = len(params["in_layers"])
    n_out = len(params["out_layers"])
    d_out = params["out_layers"][-1][0].shape[1]

    # --- batch tiling: large sublane-aligned tiles; whole batch if small -----
    TB = min(_round_up(block_rows, 8), _round_up(B, 8))
    B_pad = _round_up(B, TB)
    grid = (B_pad // TB,)

    ts = timesteps.astype(jnp.float32).reshape(B, 1)
    if B_pad != B:
        x = jnp.pad(x, ((0, B_pad - B), (0, 0)))
        ts = jnp.pad(ts, ((0, B_pad - B), (0, 0)))

    freqs = jnp.exp(
        -math.log(10000.0) * jnp.arange(half, dtype=jnp.float32) / half
    ).reshape(1, half)

    # --- pre-split weights in the wrapper (no in-kernel concat / ref slices) -
    # Odd emb_size: the zero-pad column in the PyTorch module multiplies
    # w_emb's last row by 0, so dropping that row here is exact.
    w_emb_cos = w_emb[:half, :]
    w_emb_sin = w_emb[half:2 * half, :]
    w0, b0 = params["in_layers"][0]
    w0_x, w0_e = w0[:d_x, :], w0[d_x:, :]

    flat = [w_emb_cos, w_emb_sin, b_emb, w0_x, w0_e, b0]
    for w, b in params["in_layers"][1:]:
        flat += [w, b]
    for w, b in params["out_layers"]:
        flat += [w, b]

    inputs = [ts, freqs, x]
    row_specs = [
        pl.BlockSpec((TB, 1), lambda i: (i, 0)),        # timesteps
        pl.BlockSpec((1, half), lambda i: (0, 0)),      # freqs (resident)
        pl.BlockSpec((TB, d_x), lambda i: (i, 0)),      # x
    ]
    if mess_dropout:
        # nn.Dropout(p): keep w.p. (1-p), scale kept elements by 1/(1-p).
        if dropout_key is None:
            dropout_key = jax.random.PRNGKey(0)
        if p_drop >= 1.0:
            scale = jnp.zeros((B_pad, d_x), jnp.float32)
        else:
            keep = jax.random.bernoulli(dropout_key, 1.0 - p_drop, (B_pad, d_x))
            scale = keep.astype(jnp.float32) * (1.0 / (1.0 - p_drop))
        inputs.append(scale)
        row_specs.append(pl.BlockSpec((TB, d_x), lambda i: (i, 0)))

    weight_specs = [pl.BlockSpec(a.shape, lambda i: (0, 0)) for a in flat]

    kernel = _make_kernel(n_in, n_out, norm, mess_dropout)

    # --- advisory cost estimate ----------------------------------------------
    mac_dims = ([(half, emb_size), (half, emb_size),
                 (d_x, w0_x.shape[1]), (emb_size, w0_e.shape[1])]
                + [(w.shape[0], w.shape[1]) for w, _ in params["in_layers"][1:]]
                + [(w.shape[0], w.shape[1]) for w, _ in params["out_layers"]])
    flops = 2 * B_pad * sum(a * b for a, b in mac_dims)
    trans = B_pad * (2 * half
                     + sum(w.shape[1] for w, _ in params["in_layers"])
                     + sum(w.shape[1] for w, _ in params["out_layers"][:-1]))
    n_stream = d_x * (2 if mess_dropout else 1) + 1 + d_out
    weight_bytes = 4 * sum(a.size for a in flat)
    bytes_accessed = 4 * B_pad * n_stream + weight_bytes

    # --- VMEM budget: only raise the scoped limit if the tiles need it -------
    need = 4 * (4 * TB * n_stream) + 2 * weight_bytes + (8 << 20)  # headroom
    vmem_limit = None if need <= (32 << 20) else int(min(need, 64 << 20))

    out = pl.pallas_call(
        kernel,
        out_shape=jax.ShapeDtypeStruct((B_pad, d_out), jnp.float32),
        grid=grid,
        in_specs=row_specs + weight_specs,
        out_specs=pl.BlockSpec((TB, d_out), lambda i: (i, 0)),
        compiler_params=pltpu.CompilerParams(
            dimension_semantics=("parallel",),
            vmem_limit_bytes=vmem_limit),
        cost_estimate=pl.CostEstimate(flops=flops, transcendentals=trans,
                                      bytes_accessed=bytes_accessed),
    )(*inputs, *flat)
    return out[:B]


def denoise_reference(params, x, timesteps, *, emb_size, norm=False):
    """Pure-JAX reference (mess_dropout=False path)."""
    half = emb_size // 2
    freqs = jnp.exp(-math.log(10000.0) * jnp.arange(half, dtype=jnp.float32) / half)
    temp = timesteps.astype(jnp.float32)[:, None] * freqs[None]
    time_emb = jnp.concatenate([jnp.cos(temp), jnp.sin(temp)], axis=-1)
    w_emb, b_emb = params["emb"]
    emb = time_emb @ w_emb[:time_emb.shape[-1], :] + b_emb
    if norm:
        x = x / jnp.maximum(jnp.linalg.norm(x, axis=-1, keepdims=True), 1e-12)
    h = jnp.concatenate([x, emb], axis=-1)
    for w, b in params["in_layers"]:
        h = jnp.tanh(h @ w + b)
    for i, (w, b) in enumerate(params["out_layers"]):
        h = h @ w + b
        if i != len(params["out_layers"]) - 1:
            h = jnp.tanh(h)
    return h


if __name__ == "__main__":
    B = 8
    in_dims = [64, 32]
    out_dims = [32, 64]
    emb_size = 16

    key = jax.random.PRNGKey(0)
    key, kx, kt, kp, kd = jax.random.split(key, 5)
    x = jax.random.normal(kx, (B, in_dims[0]), jnp.float32)
    timesteps = jax.random.randint(kt, (B,), 0, 1000, jnp.int32)
    params = init_params(kp, in_dims, out_dims, emb_size)

    # 1) deterministic path (no dropout) — validate against pure-JAX reference
    out_nodrop = denoise_forward(params, x, timesteps, mess_dropout=False)
    out_nodrop = jax.block_until_ready(out_nodrop)
    ref = denoise_reference(params, x, timesteps, emb_size=emb_size)
    assert out_nodrop.shape == (B, out_dims[-1])
    assert jnp.allclose(out_nodrop, ref, atol=1e-4, rtol=1e-4), "mismatch vs reference"

    # 2) gridded path: batch not a multiple of the tile (exercises grid + padding)
    B2 = 300
    key, kx2, kt2 = jax.random.split(key, 3)
    x2 = jax.random.normal(kx2, (B2, in_dims[0]), jnp.float32)
    ts2 = jax.random.randint(kt2, (B2,), 0, 1000, jnp.int32)
    out2 = denoise_forward(params, x2, ts2, mess_dropout=False, block_rows=128)
    out2 = jax.block_until_ready(out2)
    ref2 = denoise_reference(params, x2, ts2, emb_size=emb_size)
    assert out2.shape == (B2, out_dims[-1])
    assert jnp.allclose(out2, ref2, atol=1e-4, rtol=1e-4), "grid path mismatch"

    # 3) default forward semantics (mess_dropout=True) with streamed dropout mask
    out_drop = denoise_forward(params, x, timesteps, mess_dropout=True,
                               p_drop=0.5, dropout_key=kd)
    out_drop = jax.block_until_ready(out_drop)
    assert out_drop.shape == (B, out_dims[-1])

    print("KERNEL_OK")
</pallas_src>

<mosaic_0001>
module attributes {stable_mosaic.version = 11 : i64} {
  func.func @kernel(%arg0: i32, %arg1: memref<8x1xf32, #tpu.memory_space<vmem>>, %arg2: memref<1x8xf32, #tpu.memory_space<vmem>>, %arg3: memref<8x64xf32, #tpu.memory_space<vmem>>, %arg4: memref<8x16xf32, #tpu.memory_space<vmem>>, %arg5: memref<8x16xf32, #tpu.memory_space<vmem>>, %arg6: memref<1x16xf32, #tpu.memory_space<vmem>>, %arg7: memref<64x32xf32, #tpu.memory_space<vmem>>, %arg8: memref<16x32xf32, #tpu.memory_space<vmem>>, %arg9: memref<1x32xf32, #tpu.memory_space<vmem>>, %arg10: memref<32x64xf32, #tpu.memory_space<vmem>>, %arg11: memref<1x64xf32, #tpu.memory_space<vmem>>, %arg12: memref<8x64xf32, #tpu.memory_space<vmem>>) attributes {dimension_semantics = [#tpu.dimension_semantics<parallel>], iteration_bounds = array<i64: 1>, scalar_prefetch = 0 : i64, scratch_operands = 0 : i64, tpu.core_type = #tpu.core_type<tc>, window_params = [{transform_indices = @transform_0, window_bounds = array<i64: 8, 1>}, {pipeline_mode = #tpu.pipeline_mode<synchronous>, transform_indices = @transform_1, window_bounds = array<i64: 1, 8>}, {transform_indices = @transform_2, window_bounds = array<i64: 8, 64>}, {pipeline_mode = #tpu.pipeline_mode<synchronous>, transform_indices = @transform_3, window_bounds = array<i64: 8, 16>}, {pipeline_mode = #tpu.pipeline_mode<synchronous>, transform_indices = @transform_4, window_bounds = array<i64: 8, 16>}, {pipeline_mode = #tpu.pipeline_mode<synchronous>, transform_indices = @transform_5, window_bounds = array<i64: 1, 16>}, {pipeline_mode = #tpu.pipeline_mode<synchronous>, transform_indices = @transform_6, window_bounds = array<i64: 64, 32>}, {pipeline_mode = #tpu.pipeline_mode<synchronous>, transform_indices = @transform_7, window_bounds = array<i64: 16, 32>}, {pipeline_mode = #tpu.pipeline_mode<synchronous>, transform_indices = @transform_8, window_bounds = array<i64: 1, 32>}, {pipeline_mode = #tpu.pipeline_mode<synchronous>, transform_indices = @transform_9, window_bounds = array<i64: 32, 64>}, {pipeline_mode = #tpu.pipeline_mode<synchronous>, transform_indices = @transform_10, window_bounds = array<i64: 1, 64>}, {transform_indices = @transform_11, window_bounds = array<i64: 8, 64>}]} {
    %c0 = arith.constant 0 : index
    %c0_0 = arith.constant 0 : index
    %0 = vector.load %arg4[%c0, %c0_0] : memref<8x16xf32, #tpu.memory_space<vmem>>, vector<8x16xf32>
    %c0_1 = arith.constant 0 : index
    %c0_2 = arith.constant 0 : index
    %1 = vector.load %arg5[%c0_1, %c0_2] : memref<8x16xf32, #tpu.memory_space<vmem>>, vector<8x16xf32>
    %c0_3 = arith.constant 0 : index
    %c0_4 = arith.constant 0 : index
    %2 = vector.load %arg6[%c0_3, %c0_4] : memref<1x16xf32, #tpu.memory_space<vmem>>, vector<1x16xf32>
    %c0_5 = arith.constant 0 : index
    %c0_6 = arith.constant 0 : index
    %3 = vector.load %arg7[%c0_5, %c0_6] : memref<64x32xf32, #tpu.memory_space<vmem>>, vector<64x32xf32>
    %c0_7 = arith.constant 0 : index
    %c0_8 = arith.constant 0 : index
    %4 = vector.load %arg8[%c0_7, %c0_8] : memref<16x32xf32, #tpu.memory_space<vmem>>, vector<16x32xf32>
    %c0_9 = arith.constant 0 : index
    %c0_10 = arith.constant 0 : index
    %5 = vector.load %arg9[%c0_9, %c0_10] : memref<1x32xf32, #tpu.memory_space<vmem>>, vector<1x32xf32>
    %c0_11 = arith.constant 0 : index
    %c0_12 = arith.constant 0 : index
    %6 = vector.load %arg10[%c0_11, %c0_12] : memref<32x64xf32, #tpu.memory_space<vmem>>, vector<32x64xf32>
    %c0_13 = arith.constant 0 : index
    %c0_14 = arith.constant 0 : index
    %7 = vector.load %arg11[%c0_13, %c0_14] : memref<1x64xf32, #tpu.memory_space<vmem>>, vector<1x64xf32>
    %c0_15 = arith.constant 0 : index
    %c0_16 = arith.constant 0 : index
    %8 = vector.load %arg1[%c0_15, %c0_16] : memref<8x1xf32, #tpu.memory_space<vmem>>, vector<8x1xf32>
    %c0_17 = arith.constant 0 : index
    %c0_18 = arith.constant 0 : index
    %9 = vector.load %arg2[%c0_17, %c0_18] : memref<1x8xf32, #tpu.memory_space<vmem>>, vector<1x8xf32>
    %10 = vector.broadcast %8 : vector<8x1xf32> to vector<8x8xf32>
    %11 = vector.broadcast %9 : vector<1x8xf32> to vector<8x8xf32>
    %12 = arith.mulf %10, %11 : vector<8x8xf32>
    %13 = math.cos %12 : vector<8x8xf32>
    %cst = arith.constant dense<0.000000e+00> : vector<8x16xf32>
    %14 = tpu.matmul %13, %0, %cst {dimension_numbers = #tpu.dot_dimension_numbers<[1], [0], [0], [1], [0, 0, 1, 1], [], []>} : vector<8x8xf32>, vector<8x16xf32>, vector<8x16xf32> -> vector<8x16xf32>
    %15 = math.sin %12 : vector<8x8xf32>
    %cst_19 = arith.constant dense<0.000000e+00> : vector<8x16xf32>
    %16 = tpu.matmul %15, %1, %cst_19 {dimension_numbers = #tpu.dot_dimension_numbers<[1], [0], [0], [1], [0, 0, 1, 1], [], []>} : vector<8x8xf32>, vector<8x16xf32>, vector<8x16xf32> -> vector<8x16xf32>
    %17 = arith.addf %14, %16 : vector<8x16xf32>
    %18 = vector.broadcast %2 : vector<1x16xf32> to vector<8x16xf32>
    %19 = arith.addf %17, %18 : vector<8x16xf32>
    %c0_20 = arith.constant 0 : index
    %c0_21 = arith.constant 0 : index
    %20 = vector.load %arg3[%c0_20, %c0_21] : memref<8x64xf32, #tpu.memory_space<vmem>>, vector<8x64xf32>
    %cst_22 = arith.constant dense<0.000000e+00> : vector<8x32xf32>
    %21 = tpu.matmul %20, %3, %cst_22 {dimension_numbers = #tpu.dot_dimension_numbers<[1], [0], [0], [1], [0, 0, 1, 1], [], []>} : vector<8x64xf32>, vector<64x32xf32>, vector<8x32xf32> -> vector<8x32xf32>
    %cst_23 = arith.constant dense<0.000000e+00> : vector<8x32xf32>
    %22 = tpu.matmul %19, %4, %cst_23 {dimension_numbers = #tpu.dot_dimension_numbers<[1], [0], [0], [1], [0, 0, 1, 1], [], []>} : vector<8x16xf32>, vector<16x32xf32>, vector<8x32xf32> -> vector<8x32xf32>
    %23 = arith.addf %21, %22 : vector<8x32xf32>
    %24 = vector.broadcast %5 : vector<1x32xf32> to vector<8x32xf32>
    %25 = arith.addf %23, %24 : vector<8x32xf32>
    %26 = math.tanh %25 : vector<8x32xf32>
    %cst_24 = arith.constant dense<0.000000e+00> : vector<8x64xf32>
    %27 = tpu.matmul %26, %6, %cst_24 {dimension_numbers = #tpu.dot_dimension_numbers<[1], [0], [0], [1], [0, 0, 1, 1], [], []>} : vector<8x32xf32>, vector<32x64xf32>, vector<8x64xf32> -> vector<8x64xf32>
    %28 = vector.broadcast %7 : vector<1x64xf32> to vector<8x64xf32>
    %29 = arith.addf %27, %28 : vector<8x64xf32>
    %c0_25 = arith.constant 0 : index
    %c0_26 = arith.constant 0 : index
    %30 = vector.load %arg12[%c0_25, %c0_26] : memref<8x64xf32, #tpu.memory_space<vmem>>, vector<8x64xf32>
    tpu.vector_store %arg12[%c0_25, %c0_26], %29 {strides = array<i32>} : memref<8x64xf32, #tpu.memory_space<vmem>>, vector<8x64xf32>,
    return
  }
  func.func @transform_0(%arg0: i32) -> (i32, i32) {
    %c0_i32 = arith.constant 0 : i32
    %c0_i32_0 = arith.constant 0 : i32
    return %arg0, %c0_i32 : i32, i32
  }
  func.func @transform_1(%arg0: i32) -> (i32, i32) {
    %c0_i32 = arith.constant 0 : i32
    %c0_i32_0 = arith.constant 0 : i32
    %c0_i32_1 = arith.constant 0 : i32
    return %c0_i32, %c0_i32_0 : i32, i32
  }
  func.func @transform_2(%arg0: i32) -> (i32, i32) {
    %c0_i32 = arith.constant 0 : i32
    %c0_i32_0 = arith.constant 0 : i32
    return %arg0, %c0_i32 : i32, i32
  }
  func.func @transform_3(%arg0: i32) -> (i32, i32) {
    %c0_i32 = arith.constant 0 : i32
    %c0_i32_0 = arith.constant 0 : i32
    %c0_i32_1 = arith.constant 0 : i32
    return %c0_i32, %c0_i32_0 : i32, i32
  }
  func.func @transform_4(%arg0: i32) -> (i32, i32) {
    %c0_i32 = arith.constant 0 : i32
    %c0_i32_0 = arith.constant 0 : i32
    %c0_i32_1 = arith.constant 0 : i32
    return %c0_i32, %c0_i32_0 : i32, i32
  }
  func.func @transform_5(%arg0: i32) -> (i32, i32) {
    %c0_i32 = arith.constant 0 : i32
    %c0_i32_0 = arith.constant 0 : i32
    %c0_i32_1 = arith.constant 0 : i32
    return %c0_i32, %c0_i32_0 : i32, i32
  }
  func.func @transform_6(%arg0: i32) -> (i32, i32) {
    %c0_i32 = arith.constant 0 : i32
    %c0_i32_0 = arith.constant 0 : i32
    %c0_i32_1 = arith.constant 0 : i32
    return %c0_i32, %c0_i32_0 : i32, i32
  }
  func.func @transform_7(%arg0: i32) -> (i32, i32) {
    %c0_i32 = arith.constant 0 : i32
    %c0_i32_0 = arith.constant 0 : i32
    %c0_i32_1 = arith.constant 0 : i32
    return %c0_i32, %c0_i32_0 : i32, i32
  }
  func.func @transform_8(%arg0: i32) -> (i32, i32) {
    %c0_i32 = arith.constant 0 : i32
    %c0_i32_0 = arith.constant 0 : i32
    %c0_i32_1 = arith.constant 0 : i32
    return %c0_i32, %c0_i32_0 : i32, i32
  }
  func.func @transform_9(%arg0: i32) -> (i32, i32) {
    %c0_i32 = arith.constant 0 : i32
    %c0_i32_0 = arith.constant 0 : i32
    %c0_i32_1 = arith.constant 0 : i32
    return %c0_i32, %c0_i32_0 : i32, i32
  }
  func.func @transform_10(%arg0: i32) -> (i32, i32) {
    %c0_i32 = arith.constant 0 : i32
    %c0_i32_0 = arith.constant 0 : i32
    %c0_i32_1 = arith.constant 0 : i32
    return %c0_i32, %c0_i32_0 : i32, i32
  }
  func.func @transform_11(%arg0: i32) -> (i32, i32) {
    %c0_i32 = arith.constant 0 : i32
    %c0_i32_0 = arith.constant 0 : i32
    return %arg0, %c0_i32 : i32, i32
  }
}

</mosaic_0001>

<bundles_post_ra>
// kernel: tpu_custom_call.1
= control target key start
LH: loop header
LB: loop body
LE: loop exit
PB: predicated region body
PF: predicated region fallthrough
CT: control target
= control target key end

     0   :  { %v837_v1 = vmov 0   ;;  %s1030_s0 = inlined_call_operand.vmem [shape: f32[8,1], index: 0, kind: input, shape index: {}]   ;;  %s1031_s1 = inlined_call_operand.vmem [shape: f32[1,8], index: 1, kind: input, shape index: {}]   ;;  %s1032_s2 = inlined_call_operand.vmem [shape: f32[8,64], index: 2, kind: input, shape index: {}]   ;;  %s1033_s3 = inlined_call_operand.vmem [shape: f32[8,16], index: 3, kind: input, shape index: {}]   ;;  %s1034_s4 = inlined_call_operand.vmem [shape: f32[8,16], index: 4, kind: input, shape index: {}]   ;;  %s1035_s5 = inlined_call_operand.vmem [shape: f32[1,16], index: 5, kind: input, shape index: {}]   ;;  %s1036_s6 = inlined_call_operand.vmem [shape: f32[64,32], index: 6, kind: input, shape index: {}]   ;;  %s1037_s7 = inlined_call_operand.vmem [shape: f32[16,32], index: 7, kind: input, shape index: {}]   ;;  %s1038_s8 = inlined_call_operand.vmem [shape: f32[1,32], index: 8, kind: input, shape index: {}]   ;;  %s1039_s9 = inlined_call_operand.vmem [shape: f32[32,64], index: 9, kind: input, shape index: {}]   ;;  %s1040_s10 = inlined_call_operand.vmem [shape: f32[1,64], index: 10, kind: input, shape index: {}]   ;;  %s1041_s11 = inlined_call_operand.hbm [shape: f32[8,64], index: 11, kind: output, shape index: {}]  }
   0x1   :  { %v58_v0 = vld [vmem:[%s1030_s0] sm:$0xff]  ;;  %806 = vset.pattern.permute.xlu0 %v837_v1 }
   0x2   :  { %62 = vperm.xlu0 %806, %v58_v0  }
   0x3   :  { %16 = vsyncpa [#allocation3], 0  ;;  %v40_v2 = vld [vmem:[%s1034_s4] sm:$0xff]  ;;  %v838_v4 = vmov 0.0   ;;  %vm839_vm0 = vmmov 0   ;;  %v840_v5 = vmov 0.0|0.0  }
   0x4   :  { %v39_v3 = vld [vmem:[%s1033_s3] sm:$0xff]  ;;  %723 = vmatprep.subr.mxu0 %v838_v4  ;;  %728 = vmatprep.subr.mxu1 %v838_v4  ;;  %v841_v19 = vmov 683565275   ;;  %v842_v21 = vmov 2475754826   ;;  %vm279_vm10 = vcmask 64512  }
   0x5   :  { %724 = vmatpush3.msra.mxu0 %v40_v2  ;;  %725 = vmatprep.mubr.msk.f32.mxu0 %vm839_vm0, %v838_v4  ;;  %v685_v6 = vld [vmem:[%s1031_s1] ss:$0 sm:$0xff]  ;;  %v843_v24 = vmov 2131351028   ;;  %v844_v27 = vmov 2102212464  }
   0x6   :  { %729 = vmatpush3.msra.mxu1 %v39_v3  ;;  %730 = vmatprep.mubr.msk.f32.mxu1 %vm839_vm0, %v838_v4  ;;  %v845_v30 = vmov 920167782   ;;  %v846_v33 = vmov 1326507024  }
   0x7   :  { %773 = vmatprep.subr.bf16.mxu1 %v840_v5  ;;  %770 = vmatprep.subr.bf16.mxu0 %v840_v5 }
  0x81   :  { %v63_v7 = vpop.permute.xlu0 %62 }
  0x82   :  { %v928_v8 = vmul.f32 %v685_v6, %v63_v7 }
  0x84   :  { %v75_v9 = vand.u32 2139095040, %v928_v8  ;;  %v72_v13 = vand.u32 2147483647, %v928_v8  ;;  %vm74_vm8 = vcmp.lt.s32.totalorder %v928_v8, 0 }
  0x86   :  { %v76_v10 = vshrl.u32 %v75_v9, 23  ;;  %v79_v16 = vand.u32 8388607, %v72_v13  ;;  %vm73_vm9 = vcmp.le.f32.partialorder %v72_v13, 0.7853982 }
  0x88   :  { %v686_v11 = vadd.s32 4294967169, %v76_v10  ;;  %v80_v35 = vor.u32 8388608, %v79_v16 }
  0x8a   :  { %v82_v12 = vadd.s32 1, %v686_v11  ;;  %v120_v49 = vshll.u32 %v80_v35, 8 }
  0x8c   :  { %vm83_vm1 = vcmp.gt.s32.totalorder %v82_v12, 0 }
  0x8d   :  { %v84_v14 = vsel %vm83_vm1, %v82_v12, 0 }
  0x8e   :  { %v86_v15 = vand.u32 31, %v84_v14  ;;  %v85_v18 = vshrl.u32 %v84_v14, 5 }
  0x90   :  { %v87_v17 = vsub.s32 32, %v86_v15  ;;  %v89_v20 = vshll.u32 %v841_v19, %v86_v15  ;;  %v92_v22 = vshll.u32 %v842_v21, %v86_v15  ;;  %v95_v26 = vshll.u32 %v843_v24, %v86_v15 }
  0x91   :  { %v98_v29 = vshll.u32 %v844_v27, %v86_v15  ;;  %v101_v32 = vshll.u32 %v845_v30, %v86_v15  ;;  %vm104_vm2 = vcmp.lt.s32.totalorder %v85_v18, 1  ;;  %vm107_vm3 = vcmp.lt.s32.totalorder %v85_v18, 4 }
  0x92   :  { %v90_v23 = vshrl.u32 %v842_v21, %v87_v17  ;;  %v93_v25 = vshrl.u32 %v843_v24, %v87_v17  ;;  %v96_v28 = vshrl.u32 %v844_v27, %v87_v17  ;;  %v99_v31 = vshrl.u32 %v845_v30, %v87_v17 }
  0x93   :  { %v102_v34 = vshrl.u32 %v846_v33, %v87_v17  ;;  %v88_v44 = vshrl.u32 %v841_v19, %v87_v17  ;;  %vm106_vm4 = vcmp.lt.s32.totalorder %v85_v18, 3  ;;  %vm105_vm5 = vcmp.lt.s32.totalorder %v85_v18, 2  ;;  %v42_v33 = vld [vmem:[%s1036_s6] sm:$0xff] }
  0x94   :  { %v91_v36 = vor.u32 %v90_v23, %v89_v20  ;;  %v94_v37 = vor.u32 %v93_v25, %v92_v22  ;;  %v97_v38 = vor.u32 %v96_v28, %v95_v26  ;;  %v100_v39 = vor.u32 %v99_v31, %v98_v29 }
  0x95   :  { %v103_v40 = vor.u32 %v102_v34, %v101_v32  ;;  %v43_v34 = vld [vmem:[%s1036_s6 + $0x8] sm:$0xff] }
  0x96   :  { %v109_v41 = vsel %vm107_vm3, %v97_v38, 2102212464  ;;  %v112_v42 = vsel %vm104_vm2, %v91_v36, %v94_v37  ;;  %v116_v43 = vsel %vm104_vm2, %v94_v37, %v97_v38  ;;  %v113_v45 = vsel %vm107_vm3, %v100_v39, 920167782 }
  0x97   :  { %v117_v46 = vsel %vm107_vm3, %v103_v40, 1326507024  ;;  %v114_v47 = vsel %vm106_vm4, %v97_v38, %v113_v45  ;;  %v108_v50 = vsel %vm104_vm2, %v88_v44, %v91_v36  ;;  %v110_v51 = vsel %vm106_vm4, %v94_v37, %v109_v41  ;;  %v44_v45 = vld [vmem:[%s1036_s6 + $0x10] sm:$0xff] }
  0x98   :  { %v118_v48 = vsel %vm106_vm4, %v100_v39, %v117_v46  ;;  %v115_v52 = vsel %vm105_vm5, %v112_v42, %v114_v47  ;;  %v111_v58 = vsel %vm105_vm5, %v108_v50, %v110_v51  ;;  %v774_v38 = vpack.c.bf16 %v43_v34, %v42_v33  ;;  %v45_v46 = vld [vmem:[%s1036_s6 + $0x18] sm:$0xff]  ;;  %v47_v50 = vld [vmem:[%s1036_s6 + $0x28] sm:$0xff] }
  0x99   :  { %v119_v53 = vsel %vm105_vm5, %v116_v43, %v118_v48  ;;  %v937_v56 = vmul.u32.u64.low %v120_v49, %v115_v52  ;;  %v938_v57 = vmul.u32.u64.high %v120_v49, %v115_v52, %v937_v56  ;;  %v127_v60 = vmul.u32 %v120_v49, %v111_v58  ;;  %v48_v52 = vld [vmem:[%s1036_s6 + $0x30] sm:$0xff]  ;;  %v433_v58 = vld [vmem:[%s1032_s2] sm:$0xff] }
  0x9a   :  { %v934_v54 = vmul.u32.u64.low %v120_v49, %v119_v53  ;;  %v935_v55 = vmul.u32.u64.high %v120_v49, %v119_v53, %v934_v54  ;;  %vm164_vm2 = vweird.f32 %v928_v8  ;;  %v777_v49 = vpack.c.bf16 %v45_v46, %v44_v45  ;;  %v49_v53 = vld [vmem:[%s1036_s6 + $0x38] sm:$0xff] }
  0x9b   :  { %v130_v59 = vadd.s32 1, %v938_v57  ;;  %v50_v54 = vld [vmem:[%s1037_s7] sm:$0xff]  ;;  %vm508_vm3 = vcmask 523264   ;;  %vm434_vm4 = vcmask 130048  }
  0x9c   :  { %vm129_vm6 = vc.u32 %v935_v55, %v937_v56  ;;  %v128_v11 = vadd.s32 %v937_v56, %v935_v55  ;;  %v51_v55 = vld [vmem:[%s1037_s7 + $0x8] sm:$0xff]  ;;  %v783_v56 = vpack.c.bf16 %v49_v53, %v48_v52 }
  0x9d   :  { %v131_v61 = vsel %vm129_vm6, %v130_v59, %v938_v57  ;;  %v771_v57 = vpack.c.bf16 %v51_v55, %v50_v54 }
  0x9e   :  { %v132_v62 = vadd.s32 %v131_v61, %v127_v60  ;;  %v696_v60 = vld [vmem:[%s1035_s5] ss:$0 sm:$0xff] }
  0xa0   :  { %v133_v63 = vadd.s32 536870912, %v132_v62 }
  0xa2   :  { %v134_v0 = vshrl.u32 %v133_v63, 30 }
  0xa4   :  { %v135_v1 = vshll.u32 %v134_v0, 30  ;;  %v158_v24 = vsub.s32 4, %v134_v0 }
  0xa6   :  { %v136_v2 = vsub.s32 %v132_v62, %v135_v1  ;;  %v159_v27 = vsel %vm74_vm8, %v158_v24, %v134_v0 }
  0xa7   :  { %v161_v29 = vsel %vm73_vm9, 0, %v159_v27 }
  0xa8   :  { %v138_v3 = vsub.s32 0, %v136_v2  ;;  %v268_v30 = vadd.s32 3, %v161_v29  ;;  %v165_v32 = vand.u32 3, %v161_v29 }
  0xaa   :  { %v687_v6 = vmin.u32 %v138_v3, %v136_v2  ;;  %v269_v31 = vand.u32 3, %v268_v30  ;;  %vm170_vm12 = vcmp.eq.s32.totalorder %v165_v32, 2  ;;  %vm167_vm14 = vcmp.eq.s32.totalorder %v165_v32, 0 }
  0xab   :  { %vm166_vm1 = vcmp.lt.s32.totalorder %v165_v32, 2 }
  0xac   :  { %v140_v7 = vclz %v687_v6  ;;  %vm274_vm11 = vcmp.eq.s32.totalorder %v269_v31, 2  ;;  %vm271_vm13 = vcmp.eq.s32.totalorder %v269_v31, 0  ;;  %vm270_vm15 = vcmp.lt.s32.totalorder %v269_v31, 2  ;;  %v53_v6 = vld [vmem:[%s1039_s9] sm:$0xff] }
  0xae   :  { %v688_v9 = vadd.s32 4294967294, %v140_v7  ;;  %v54_v7 = vld [vmem:[%s1039_s9 + $0x8] sm:$0xff] }
  0xb0   :  { %vm689_vm7 = vcmp.lt.s32.totalorder %v688_v9, 0 }
  0xb1   :  { %v143_v10 = vsel %vm689_vm7, 0, %v688_v9  ;;  %v55_v9 = vld [vmem:[%s1039_s9 + $0x10] sm:$0xff] }
  0xb2   :  { %v144_v12 = vsub.s32 32, %v143_v10  ;;  %v148_v14 = vsub.s32 4294967266, %v143_v10  ;;  %v145_v15 = vshll.u32 %v136_v2, %v143_v10  ;;  %v786_v10 = vpack.c.bf16 %v54_v7, %v53_v6 }
  0xb4   :  { %v146_v16 = vshrl.u32 %v128_v11, %v144_v12  ;;  %v149_v17 = vadd.s32 127, %v148_v14  ;;  %v56_v11 = vld [vmem:[%s1039_s9 + $0x18] sm:$0xff]  ;;  %v699_v12 = vld [vmem:[%s1038_s8] ss:$0 sm:$0xff]  ;;  %s847_s9 = smov [#allocation2]  }
  0xb5   :  { %s677_s30 = sshll.u32 %s847_s9, 4  ;;  %s678_s30 = int_to_ptr.vmem [resolvable:$true] %s677_s30 }
  0xb6   :  { %v147_v18 = vor.u32 %v146_v16, %v145_v15  ;;  %v150_v19 = vshll.u32 %v149_v17, 23  ;;  %s813_s8 = scalar_lea.vmem %s678_s30, 128  ;;  %p818_p1 = scmp.lt.s32.totalorder %s678_s30, %s678_s30 }
  0xb7   :  { %p814_p0 = scmp.ne.s32.totalorder %s678_s30, %s813_s8  ;;  %p819_p2 = scmp.lt.s32.totalorder %s813_s8, %s813_s8 }
  0xb8   :  { %v151_v20 = vor.u32 4788187, %v150_v19  ;;  %v154_v22 = vcvt.s32.f32 %v147_v18  ;;  %v700_v19 = vld [vmem:[%s1040_s10] ss:$0 sm:$0xff] }
  0xb9   :  { %p820_p3 = por %p819_p2, %p818_p1 }
  0xba   :  { %v152_v21 = vand.u32 2147483647, %v151_v20 }
  0xbb   :  { %p821_p4 = pnand %p820_p3, %p814_p0 }
  0xbc   :  { %v155_v23 = vmul.f32 %v154_v22, %v152_v21 }
  0xbe   :  { %v156_v25 = vxor.u32 2147483648, %v155_v23 }
  0xc0   :  { %v157_v26 = vsel %vm74_vm8, %v156_v25, %v155_v23 }
  0xc1   :  { %v160_v28 = vsel %vm73_vm9, %v928_v8, %v157_v26  ;;  %v46_v8 = vld [vmem:[%s1036_s6 + $0x20] sm:$0xff] }
  0xc2   :  { %807 = vcosq.f32 %v160_v28  ;;  %v780_v51 = vpack.c.bf16 %v47_v50, %v46_v8 }
  0xc3   :  { %809 = vsinq.f32 %v160_v28 }
  0xcc   :  { %v808_v35 = vpop.eup %807 }
  0xcd   :  { %v810_v13 = vpop.eup %809  ;;  %v171_v36 = vxor.u32 2147483648, %v808_v35 }
  0xce   :  { %v168_v37 = vxor.u32 2147483648, %v810_v13 }
  0xcf   :  { %v276_v39 = vsel %vm274_vm11, %v171_v36, %v810_v13  ;;  %v172_v40 = vsel %vm170_vm12, %v171_v36, %v810_v13 }
  0xd0   :  { %v273_v41 = vsel %vm271_vm13, %v808_v35, %v168_v37  ;;  %v169_v42 = vsel %vm167_vm14, %v808_v35, %v168_v37 }
  0xd1   :  { %v277_v43 = vsel %vm270_vm15, %v273_v41, %v276_v39  ;;  %v173_v44 = vsel %vm166_vm1, %v169_v42, %v172_v40 }
  0xd2   :  { %v278_v47 = vsel %vm164_vm2, nan, %v277_v43  ;;  %v174_v48 = vsel %vm164_vm2, nan, %v173_v44 }
  0xd3   :  { %726 = vmatmul.mubr.msk.f32.vlgmr.msra.gmra.mrb[0].mxu0 %vm279_vm10, %v278_v47  ;;  %731 = vmatmul.mubr.msk.f32.vlgmr.msra.gmra.mrb[0].mxu1 %vm279_vm10, %v174_v48 }
  0xd4   :  { %775 = vmatpush3.bf16.msra.mxu1 %v774_v38  ;;  %756 = vmatprep.mubr.msk.f32.mxu1 %vm839_vm0, %v838_v4 }
  0xd5   :  { %776 = vmatprep.subr.bf16.mxu1 %v840_v5  ;;  %737 = vmatprep.mubr.msk.f32.mxu0 %vm839_vm0, %v838_v4 }
  0xd6   :  { %772 = vmatpush3.bf16.msra.mxu0 %v771_v57 }
  0xd7   :  { %785 = vmatprep.subr.bf16.mxu0 %v840_v5 }
  0xd8   :  { %778 = vmatpush3.bf16.msra.mxu1 %v777_v49 }
  0xd9   :  { %779 = vmatprep.subr.bf16.mxu1 %v840_v5 }
  0xdc   :  { %781 = vmatpush3.bf16.msra.mxu1 %v780_v51 }
  0xdd   :  { %782 = vmatprep.subr.bf16.mxu1 %v840_v5 }
  0xe0   :  { %784 = vmatpush3.bf16.msra.mxu1 %v783_v56 }
  0xe3   :  { %757 = vmatmul.mubr.msk.f32.vlgmr.msra.gmra.mrb[2].mxu1 %vm508_vm3, %v433_v58 }
 0x1a6   :  { %v349_v59 = vpop.f32.mrb[0].mxu0  ;;  %v422_v61 = vpop.f32.mrb[0].mxu1 }
 0x1a7   :  { %v423_v62 = vadd.f32 %v422_v61, %v349_v59  ;;  %v727_v63 = vpop.f32.mrb[1].mxu0  ;;  %v732_v0 = vpop.f32.mrb[1].mxu1 }
 0x1a9   :  { %v432_v1 = vadd.f32 %v696_v60, %v423_v62 }
 0x1ab   :  { %738 = vmatmul.mubr.msk.f32.vlgmr.msra.gmra.mrb[2].mxu0 %vm434_vm4, %v432_v1 }
 0x1ac   :  { %767 = vmatprep.mubr.msk.f32.mxu0 %vm839_vm0, %v838_v4  ;;  %787 = vmatpush3.bf16.msra.mxu0 %v786_v10  ;;  %v789_v4 = vpack.c.bf16 %v56_v11, %v55_v9  ;;  %vm596_vm0 = vcmask 261120  }
 0x1ad   :  { %788 = vmatprep.subr.bf16.mxu0 %v840_v5 }
 0x1b0   :  { %790 = vmatpush3.bf16.msra.mxu0 %v789_v4 }
 0x1b6   :  { %v578_v2 = vpop.f32.mrb[2].mxu1 }
 0x1b7   :  { %v758_v3 = vpop.f32.mrb[3].mxu1 }
 0x27e   :  { %v504_v14 = vpop.f32.mrb[2].mxu0 }
 0x27f   :  { %v579_v15 = vadd.f32 %v578_v2, %v504_v14  ;;  %v739_v16 = vpop.f32.mrb[3].mxu0 }
 0x281   :  { %v588_v17 = vadd.f32 %v699_v12, %v579_v15 }
 0x283   :  { %811 = vtanh.f32 %v588_v17 }
 0x28d   :  { %v812_v18 = vpop.eup %811 }
 0x28e   :  { %768 = vmatmul.mubr.msk.f32.vlgmr.msra.gmra.mrb[4].mxu0 %vm596_vm0, %v812_v18 }
 0x361   :  { %v666_v5 = vpop.f32.mrb[4].mxu0 }
 0x362   :  { %v667_v20 = vadd.f32 %v700_v19, %v666_v5  ;;  %v769_v21 = vpop.f32.mrb[5].mxu0 }
 0x364   :  { %670 = vst.msk [vmem:[#allocation2] sm:$0xff] %vm508_vm3, %v667_v20 }
 0x365   :  { %824 = shalt.err (!%p821_p4)
}
 0x366   :  { %s825_s14 = scalar_lea.hbm %s1041_s11, 128 }
 0x367   :  { %p826_p5 = scmp.ne.s32.totalorder %s1041_s11, %s825_s14  ;;  %p829_p6 = scmp.lt.u32.totalorder %s825_s14, %s1041_s11 }
 0x369   :  { %p831_p7 = pnand %p829_p6, %p826_p5 }
 0x36b   :  { %834 = shalt.err (!%p831_p7)
}
 0x36c   :  { %680 = dma.vmem_to_hbm [thread:$0]  %s678_s30, 128, %s1041_s11, [#allocation3]  }
 0x36d   :  { %835 = dma.done.wait [#allocation3], 128  }
 0x36e   :  { %836 = vsyncadd [#allocation3], 4294967168 }
 0x36f   :  { %684 = vsyncpa [#allocation3], 1 }

</bundles_post_ra>
